<compile_context>
chip_gen: v5e
topology: v5e:2x2
jax: 0.10.0
libtpu: 0.0.40
codegen_flags: <defaults>
</compile_context>

<pallas_src>
import itertools
import math

import jax
import jax.numpy as jnp
from jax.experimental import pallas as pl
from jax.experimental.pallas import tpu as pltpu


def _flatten_block_kernel(x_ref, o_ref):
    """Copy an N-D input block into the flattened 2-D output block.

    x_ref: (bt, ct, d2, ..., d_{n-1}, W)      o_ref: (bt, ct*d2*...*d_{n-1}*W)
    Row-major flatten => slab x[:, c, m2, ..., :] lands at output columns
    [flat*W, (flat+1)*W) with flat = ravel(c, m2, ...).  Only static scalar
    indices / static slices are used, so the body always lowers on Mosaic.
    """
    w = x_ref.shape[-1]
    lead = x_ref.shape[1:-1]
    # TODO(synk): for trailing dims << 128 these are masked (narrow) VMEM
    # stores; a bitcast/packing scheme could recover full vst width.
    for flat, idx in enumerate(itertools.product(*map(range, lead))):
        o_ref[:, flat * w:(flat + 1) * w] = x_ref[(slice(None),) + idx + (slice(None),)]


def _choose_tiles(shape, itemsize, target_block_bytes, max_unroll):
    """Pick (b_tile, c_tile): divisors of (B, d1) honoring the TPU (8,128)
    block constraints, capped by the per-block byte budget and the per-block
    store-unroll budget, preferring a grid of >=2 steps (v7x has 2 TCs)."""
    B, d1 = shape[0], shape[1]
    f_inner = math.prod(shape[2:])       # elements per d1-slice per batch row
    mid = math.prod(shape[2:-1])         # unrolled stores per unit of c_tile
    ndim = len(shape)

    def c_ok(ct):
        # Output block is (b_tile, ct*f_inner): lane dim 128-aligned or full.
        if (ct * f_inner) % 128 != 0 and ct != d1:
            return False
        # For 3-D inputs, ct is the sublane dim of the input block.
        if ndim == 3 and ct % 8 != 0 and ct != d1:
            return False
        return True

    c_divs = [c for c in range(1, d1 + 1) if d1 % c == 0 and c_ok(c)]  # d1 always valid
    b_divs = sorted(set(b for b in range(8, B + 1, 8) if B % b == 0) | {B})

    base_bt = B if B < 8 else 8

    def blk_bytes(bt, ct):
        return bt * ct * f_inner * itemsize

    # c_tile: biggest valid divisor within the unroll + byte budgets.
    cands = [c for c in c_divs
             if c * mid <= max_unroll and blk_bytes(base_bt, c) <= target_block_bytes]
    ct = max(cands) if cands else min(c_divs)

    # b_tile: biggest divisor (multiple of 8, or B itself) within the budget.
    cands = [b for b in b_divs if blk_bytes(b, ct) <= target_block_bytes]
    bt = max(cands) if cands else min(b_divs)

    # Prefer >=2 grid steps so ("parallel","parallel") can use both v7x cores.
    if B // bt == 1 and d1 // ct == 1:
        half_c = [c for c in c_divs if c <= d1 // 2 and c * mid <= max_unroll]
        half_b = [b for b in b_divs if b <= B // 2]
        if half_c:
            ct = max(half_c)
        elif half_b:
            bt = max(half_b)
    return bt, ct


def flatten_pallas(x, *, target_block_bytes=4 * 1024 * 1024, max_unroll=512):
    """Equivalent of torch `x.view(batch_size, -1)` for an N-D input."""
    b = x.shape[0]
    if x.ndim <= 2:
        # Already flat (or 1-D): flatten is a pure metadata view -> zero copy.
        return x.reshape(b, -1)

    f = math.prod(x.shape[1:])
    d1 = x.shape[1]
    f_inner = f // d1
    itemsize = jnp.dtype(x.dtype).itemsize
    bt, ct = _choose_tiles(x.shape, itemsize, target_block_bytes, max_unroll)

    n_trail = x.ndim - 2
    grid = (b // bt, d1 // ct)

    in_spec = pl.BlockSpec(
        (bt, ct) + x.shape[2:],
        lambda i, j: (i, j) + (0,) * n_trail)
    out_spec = pl.BlockSpec((bt, ct * f_inner), lambda i, j: (i, j))

    # TODO(synk): inputs whose trailing dim alone exceeds the block budget are
    # not tiled along that dim (would need strided output blocks).
    return pl.pallas_call(
        _flatten_block_kernel,
        out_shape=jax.ShapeDtypeStruct((b, f), x.dtype),
        grid=grid,
        in_specs=[in_spec],
        out_specs=out_spec,
        compiler_params=pltpu.CompilerParams(
            dimension_semantics=("parallel", "parallel"),
            vmem_limit_bytes=32 * 1024 * 1024,
        ),
    )(x)


if __name__ == "__main__":
    key = jax.random.PRNGKey(0)
    k0, k1, k2 = jax.random.split(key, 3)

    # Small NCHW input consistent with a conv-style feature map.
    B, C, H, W = 2, 4, 16, 16
    x = jax.random.normal(k0, (B, C, H, W), dtype=jnp.float32)
    y = jax.block_until_ready(flatten_pallas(x))
    assert y.shape == (B, C * H * W), y.shape
    assert y.dtype == x.dtype
    assert bool(jnp.array_equal(y, x.reshape(B, -1)))

    # Odd-sized input: no valid lane-aligned split -> single full-extent block.
    x2 = jax.random.normal(k1, (2, 3, 5, 7), dtype=jnp.float32)
    y2 = jax.block_until_ready(flatten_pallas(x2))
    assert y2.shape == (2, 3 * 5 * 7)
    assert bool(jnp.array_equal(y2, x2.reshape(2, -1)))

    # 3-D input exercises the "split dim is second-minor" constraint path.
    x3 = jax.random.normal(k2, (2, 8, 32), dtype=jnp.float32)
    y3 = jax.block_until_ready(flatten_pallas(x3))
    assert y3.shape == (2, 8 * 32)
    assert bool(jnp.array_equal(y3, x3.reshape(2, -1)))

    print("KERNEL_OK")
</pallas_src>

<mosaic_0001>
module attributes {stable_mosaic.version = 11 : i64} {
  func.func @_flatten_block_kernel(%arg0: i32, %arg1: i32, %arg2: memref<2x2x16x16xf32, #tpu.memory_space<vmem>>, %arg3: memref<2x512xf32, #tpu.memory_space<vmem>>) attributes {dimension_semantics = [#tpu.dimension_semantics<parallel>, #tpu.dimension_semantics<parallel>], iteration_bounds = array<i64: 1, 2>, scalar_prefetch = 0 : i64, scratch_operands = 0 : i64, tpu.core_type = #tpu.core_type<tc>, window_params = [{transform_indices = @transform_0, window_bounds = array<i64: 2, 2, 16, 16>}, {transform_indices = @transform_1, window_bounds = array<i64: 2, 512>}]} {
    %c0 = arith.constant 0 : index
    %c0_0 = arith.constant 0 : index
    %c0_1 = arith.constant 0 : index
    %c0_2 = arith.constant 0 : index
    %0 = vector.load %arg2[%c0, %c0_0, %c0_1, %c0_2] : memref<2x2x16x16xf32, #tpu.memory_space<vmem>>, vector<2x1x1x16xf32>
    %1 = vector.shape_cast %0 : vector<2x1x1x16xf32> to vector<2x16xf32>
    %c0_3 = arith.constant 0 : index
    %c0_4 = arith.constant 0 : index
    %2 = vector.load %arg3[%c0_3, %c0_4] : memref<2x512xf32, #tpu.memory_space<vmem>>, vector<2x16xf32>
    tpu.vector_store %arg3[%c0_3, %c0_4], %1 {strides = array<i32>} : memref<2x512xf32, #tpu.memory_space<vmem>>, vector<2x16xf32>,
    %c0_5 = arith.constant 0 : index
    %c0_6 = arith.constant 0 : index
    %c1 = arith.constant 1 : index
    %c0_7 = arith.constant 0 : index
    %3 = vector.load %arg2[%c0_5, %c0_6, %c1, %c0_7] : memref<2x2x16x16xf32, #tpu.memory_space<vmem>>, vector<2x1x1x16xf32>
    %4 = vector.shape_cast %3 : vector<2x1x1x16xf32> to vector<2x16xf32>
    %c0_8 = arith.constant 0 : index
    %c16 = arith.constant 16 : index
    %5 = vector.load %arg3[%c0_8, %c16] : memref<2x512xf32, #tpu.memory_space<vmem>>, vector<2x16xf32>
    tpu.vector_store %arg3[%c0_8, %c16], %4 {strides = array<i32>} : memref<2x512xf32, #tpu.memory_space<vmem>>, vector<2x16xf32>,
    %c0_9 = arith.constant 0 : index
    %c0_10 = arith.constant 0 : index
    %c2 = arith.constant 2 : index
    %c0_11 = arith.constant 0 : index
    %6 = vector.load %arg2[%c0_9, %c0_10, %c2, %c0_11] : memref<2x2x16x16xf32, #tpu.memory_space<vmem>>, vector<2x1x1x16xf32>
    %7 = vector.shape_cast %6 : vector<2x1x1x16xf32> to vector<2x16xf32>
    %c0_12 = arith.constant 0 : index
    %c32 = arith.constant 32 : index
    %8 = vector.load %arg3[%c0_12, %c32] : memref<2x512xf32, #tpu.memory_space<vmem>>, vector<2x16xf32>
    tpu.vector_store %arg3[%c0_12, %c32], %7 {strides = array<i32>} : memref<2x512xf32, #tpu.memory_space<vmem>>, vector<2x16xf32>,
    %c0_13 = arith.constant 0 : index
    %c0_14 = arith.constant 0 : index
    %c3 = arith.constant 3 : index
    %c0_15 = arith.constant 0 : index
    %9 = vector.load %arg2[%c0_13, %c0_14, %c3, %c0_15] : memref<2x2x16x16xf32, #tpu.memory_space<vmem>>, vector<2x1x1x16xf32>
    %10 = vector.shape_cast %9 : vector<2x1x1x16xf32> to vector<2x16xf32>
    %c0_16 = arith.constant 0 : index
    %c48 = arith.constant 48 : index
    %11 = vector.load %arg3[%c0_16, %c48] : memref<2x512xf32, #tpu.memory_space<vmem>>, vector<2x16xf32>
    tpu.vector_store %arg3[%c0_16, %c48], %10 {strides = array<i32>} : memref<2x512xf32, #tpu.memory_space<vmem>>, vector<2x16xf32>,
    %c0_17 = arith.constant 0 : index
    %c0_18 = arith.constant 0 : index
    %c4 = arith.constant 4 : index
    %c0_19 = arith.constant 0 : index
    %12 = vector.load %arg2[%c0_17, %c0_18, %c4, %c0_19] : memref<2x2x16x16xf32, #tpu.memory_space<vmem>>, vector<2x1x1x16xf32>
    %13 = vector.shape_cast %12 : vector<2x1x1x16xf32> to vector<2x16xf32>
    %c0_20 = arith.constant 0 : index
    %c64 = arith.constant 64 : index
    %14 = vector.load %arg3[%c0_20, %c64] : memref<2x512xf32, #tpu.memory_space<vmem>>, vector<2x16xf32>
    tpu.vector_store %arg3[%c0_20, %c64], %13 {strides = array<i32>} : memref<2x512xf32, #tpu.memory_space<vmem>>, vector<2x16xf32>,
    %c0_21 = arith.constant 0 : index
    %c0_22 = arith.constant 0 : index
    %c5 = arith.constant 5 : index
    %c0_23 = arith.constant 0 : index
    %15 = vector.load %arg2[%c0_21, %c0_22, %c5, %c0_23] : memref<2x2x16x16xf32, #tpu.memory_space<vmem>>, vector<2x1x1x16xf32>
    %16 = vector.shape_cast %15 : vector<2x1x1x16xf32> to vector<2x16xf32>
    %c0_24 = arith.constant 0 : index
    %c80 = arith.constant 80 : index
    %17 = vector.load %arg3[%c0_24, %c80] : memref<2x512xf32, #tpu.memory_space<vmem>>, vector<2x16xf32>
    tpu.vector_store %arg3[%c0_24, %c80], %16 {strides = array<i32>} : memref<2x512xf32, #tpu.memory_space<vmem>>, vector<2x16xf32>,
    %c0_25 = arith.constant 0 : index
    %c0_26 = arith.constant 0 : index
    %c6 = arith.constant 6 : index
    %c0_27 = arith.constant 0 : index
    %18 = vector.load %arg2[%c0_25, %c0_26, %c6, %c0_27] : memref<2x2x16x16xf32, #tpu.memory_space<vmem>>, vector<2x1x1x16xf32>
    %19 = vector.shape_cast %18 : vector<2x1x1x16xf32> to vector<2x16xf32>
    %c0_28 = arith.constant 0 : index
    %c96 = arith.constant 96 : index
    %20 = vector.load %arg3[%c0_28, %c96] : memref<2x512xf32, #tpu.memory_space<vmem>>, vector<2x16xf32>
    tpu.vector_store %arg3[%c0_28, %c96], %19 {strides = array<i32>} : memref<2x512xf32, #tpu.memory_space<vmem>>, vector<2x16xf32>,
    %c0_29 = arith.constant 0 : index
    %c0_30 = arith.constant 0 : index
    %c7 = arith.constant 7 : index
    %c0_31 = arith.constant 0 : index
    %21 = vector.load %arg2[%c0_29, %c0_30, %c7, %c0_31] : memref<2x2x16x16xf32, #tpu.memory_space<vmem>>, vector<2x1x1x16xf32>
    %22 = vector.shape_cast %21 : vector<2x1x1x16xf32> to vector<2x16xf32>
    %c0_32 = arith.constant 0 : index
    %c112 = arith.constant 112 : index
    %23 = vector.load %arg3[%c0_32, %c112] : memref<2x512xf32, #tpu.memory_space<vmem>>, vector<2x16xf32>
    tpu.vector_store %arg3[%c0_32, %c112], %22 {strides = array<i32>} : memref<2x512xf32, #tpu.memory_space<vmem>>, vector<2x16xf32>,
    %c0_33 = arith.constant 0 : index
    %c0_34 = arith.constant 0 : index
    %c8 = arith.constant 8 : index
    %c0_35 = arith.constant 0 : index
    %24 = vector.load %arg2[%c0_33, %c0_34, %c8, %c0_35] : memref<2x2x16x16xf32, #tpu.memory_space<vmem>>, vector<2x1x1x16xf32>
    %25 = vector.shape_cast %24 : vector<2x1x1x16xf32> to vector<2x16xf32>
    %c0_36 = arith.constant 0 : index
    %c128 = arith.constant 128 : index
    %26 = vector.load %arg3[%c0_36, %c128] : memref<2x512xf32, #tpu.memory_space<vmem>>, vector<2x16xf32>
    tpu.vector_store %arg3[%c0_36, %c128], %25 {strides = array<i32>} : memref<2x512xf32, #tpu.memory_space<vmem>>, vector<2x16xf32>,
    %c0_37 = arith.constant 0 : index
    %c0_38 = arith.constant 0 : index
    %c9 = arith.constant 9 : index
    %c0_39 = arith.constant 0 : index
    %27 = vector.load %arg2[%c0_37, %c0_38, %c9, %c0_39] : memref<2x2x16x16xf32, #tpu.memory_space<vmem>>, vector<2x1x1x16xf32>
    %28 = vector.shape_cast %27 : vector<2x1x1x16xf32> to vector<2x16xf32>
    %c0_40 = arith.constant 0 : index
    %c144 = arith.constant 144 : index
    %29 = vector.load %arg3[%c0_40, %c144] : memref<2x512xf32, #tpu.memory_space<vmem>>, vector<2x16xf32>
    tpu.vector_store %arg3[%c0_40, %c144], %28 {strides = array<i32>} : memref<2x512xf32, #tpu.memory_space<vmem>>, vector<2x16xf32>,
    %c0_41 = arith.constant 0 : index
    %c0_42 = arith.constant 0 : index
    %c10 = arith.constant 10 : index
    %c0_43 = arith.constant 0 : index
    %30 = vector.load %arg2[%c0_41, %c0_42, %c10, %c0_43] : memref<2x2x16x16xf32, #tpu.memory_space<vmem>>, vector<2x1x1x16xf32>
    %31 = vector.shape_cast %30 : vector<2x1x1x16xf32> to vector<2x16xf32>
    %c0_44 = arith.constant 0 : index
    %c160 = arith.constant 160 : index
    %32 = vector.load %arg3[%c0_44, %c160] : memref<2x512xf32, #tpu.memory_space<vmem>>, vector<2x16xf32>
    tpu.vector_store %arg3[%c0_44, %c160], %31 {strides = array<i32>} : memref<2x512xf32, #tpu.memory_space<vmem>>, vector<2x16xf32>,
    %c0_45 = arith.constant 0 : index
    %c0_46 = arith.constant 0 : index
    %c11 = arith.constant 11 : index
    %c0_47 = arith.constant 0 : index
    %33 = vector.load %arg2[%c0_45, %c0_46, %c11, %c0_47] : memref<2x2x16x16xf32, #tpu.memory_space<vmem>>, vector<2x1x1x16xf32>
    %34 = vector.shape_cast %33 : vector<2x1x1x16xf32> to vector<2x16xf32>
    %c0_48 = arith.constant 0 : index
    %c176 = arith.constant 176 : index
    %35 = vector.load %arg3[%c0_48, %c176] : memref<2x512xf32, #tpu.memory_space<vmem>>, vector<2x16xf32>
    tpu.vector_store %arg3[%c0_48, %c176], %34 {strides = array<i32>} : memref<2x512xf32, #tpu.memory_space<vmem>>, vector<2x16xf32>,
    %c0_49 = arith.constant 0 : index
    %c0_50 = arith.constant 0 : index
    %c12 = arith.constant 12 : index
    %c0_51 = arith.constant 0 : index
    %36 = vector.load %arg2[%c0_49, %c0_50, %c12, %c0_51] : memref<2x2x16x16xf32, #tpu.memory_space<vmem>>, vector<2x1x1x16xf32>
    %37 = vector.shape_cast %36 : vector<2x1x1x16xf32> to vector<2x16xf32>
    %c0_52 = arith.constant 0 : index
    %c192 = arith.constant 192 : index
    %38 = vector.load %arg3[%c0_52, %c192] : memref<2x512xf32, #tpu.memory_space<vmem>>, vector<2x16xf32>
    tpu.vector_store %arg3[%c0_52, %c192], %37 {strides = array<i32>} : memref<2x512xf32, #tpu.memory_space<vmem>>, vector<2x16xf32>,
    %c0_53 = arith.constant 0 : index
    %c0_54 = arith.constant 0 : index
    %c13 = arith.constant 13 : index
    %c0_55 = arith.constant 0 : index
    %39 = vector.load %arg2[%c0_53, %c0_54, %c13, %c0_55] : memref<2x2x16x16xf32, #tpu.memory_space<vmem>>, vector<2x1x1x16xf32>
    %40 = vector.shape_cast %39 : vector<2x1x1x16xf32> to vector<2x16xf32>
    %c0_56 = arith.constant 0 : index
    %c208 = arith.constant 208 : index
    %41 = vector.load %arg3[%c0_56, %c208] : memref<2x512xf32, #tpu.memory_space<vmem>>, vector<2x16xf32>
    tpu.vector_store %arg3[%c0_56, %c208], %40 {strides = array<i32>} : memref<2x512xf32, #tpu.memory_space<vmem>>, vector<2x16xf32>,
    %c0_57 = arith.constant 0 : index
    %c0_58 = arith.constant 0 : index
    %c14 = arith.constant 14 : index
    %c0_59 = arith.constant 0 : index
    %42 = vector.load %arg2[%c0_57, %c0_58, %c14, %c0_59] : memref<2x2x16x16xf32, #tpu.memory_space<vmem>>, vector<2x1x1x16xf32>
    %43 = vector.shape_cast %42 : vector<2x1x1x16xf32> to vector<2x16xf32>
    %c0_60 = arith.constant 0 : index
    %c224 = arith.constant 224 : index
    %44 = vector.load %arg3[%c0_60, %c224] : memref<2x512xf32, #tpu.memory_space<vmem>>, vector<2x16xf32>
    tpu.vector_store %arg3[%c0_60, %c224], %43 {strides = array<i32>} : memref<2x512xf32, #tpu.memory_space<vmem>>, vector<2x16xf32>,
    %c0_61 = arith.constant 0 : index
    %c0_62 = arith.constant 0 : index
    %c15 = arith.constant 15 : index
    %c0_63 = arith.constant 0 : index
    %45 = vector.load %arg2[%c0_61, %c0_62, %c15, %c0_63] : memref<2x2x16x16xf32, #tpu.memory_space<vmem>>, vector<2x1x1x16xf32>
    %46 = vector.shape_cast %45 : vector<2x1x1x16xf32> to vector<2x16xf32>
    %c0_64 = arith.constant 0 : index
    %c240 = arith.constant 240 : index
    %47 = vector.load %arg3[%c0_64, %c240] : memref<2x512xf32, #tpu.memory_space<vmem>>, vector<2x16xf32>
    tpu.vector_store %arg3[%c0_64, %c240], %46 {strides = array<i32>} : memref<2x512xf32, #tpu.memory_space<vmem>>, vector<2x16xf32>,
    %c0_65 = arith.constant 0 : index
    %c1_66 = arith.constant 1 : index
    %c0_67 = arith.constant 0 : index
    %c0_68 = arith.constant 0 : index
    %48 = vector.load %arg2[%c0_65, %c1_66, %c0_67, %c0_68] : memref<2x2x16x16xf32, #tpu.memory_space<vmem>>, vector<2x1x1x16xf32>
    %49 = vector.shape_cast %48 : vector<2x1x1x16xf32> to vector<2x16xf32>
    %c0_69 = arith.constant 0 : index
    %c256 = arith.constant 256 : index
    %50 = vector.load %arg3[%c0_69, %c256] : memref<2x512xf32, #tpu.memory_space<vmem>>, vector<2x16xf32>
    tpu.vector_store %arg3[%c0_69, %c256], %49 {strides = array<i32>} : memref<2x512xf32, #tpu.memory_space<vmem>>, vector<2x16xf32>,
    %c0_70 = arith.constant 0 : index
    %c1_71 = arith.constant 1 : index
    %c1_72 = arith.constant 1 : index
    %c0_73 = arith.constant 0 : index
    %51 = vector.load %arg2[%c0_70, %c1_71, %c1_72, %c0_73] : memref<2x2x16x16xf32, #tpu.memory_space<vmem>>, vector<2x1x1x16xf32>
    %52 = vector.shape_cast %51 : vector<2x1x1x16xf32> to vector<2x16xf32>
    %c0_74 = arith.constant 0 : index
    %c272 = arith.constant 272 : index
    %53 = vector.load %arg3[%c0_74, %c272] : memref<2x512xf32, #tpu.memory_space<vmem>>, vector<2x16xf32>
    tpu.vector_store %arg3[%c0_74, %c272], %52 {strides = array<i32>} : memref<2x512xf32, #tpu.memory_space<vmem>>, vector<2x16xf32>,
    %c0_75 = arith.constant 0 : index
    %c1_76 = arith.constant 1 : index
    %c2_77 = arith.constant 2 : index
    %c0_78 = arith.constant 0 : index
    %54 = vector.load %arg2[%c0_75, %c1_76, %c2_77, %c0_78] : memref<2x2x16x16xf32, #tpu.memory_space<vmem>>, vector<2x1x1x16xf32>
    %55 = vector.shape_cast %54 : vector<2x1x1x16xf32> to vector<2x16xf32>
    %c0_79 = arith.constant 0 : index
    %c288 = arith.constant 288 : index
    %56 = vector.load %arg3[%c0_79, %c288] : memref<2x512xf32, #tpu.memory_space<vmem>>, vector<2x16xf32>
    tpu.vector_store %arg3[%c0_79, %c288], %55 {strides = array<i32>} : memref<2x512xf32, #tpu.memory_space<vmem>>, vector<2x16xf32>,
    %c0_80 = arith.constant 0 : index
    %c1_81 = arith.constant 1 : index
    %c3_82 = arith.constant 3 : index
    %c0_83 = arith.constant 0 : index
    %57 = vector.load %arg2[%c0_80, %c1_81, %c3_82, %c0_83] : memref<2x2x16x16xf32, #tpu.memory_space<vmem>>, vector<2x1x1x16xf32>
    %58 = vector.shape_cast %57 : vector<2x1x1x16xf32> to vector<2x16xf32>
    %c0_84 = arith.constant 0 : index
    %c304 = arith.constant 304 : index
    %59 = vector.load %arg3[%c0_84, %c304] : memref<2x512xf32, #tpu.memory_space<vmem>>, vector<2x16xf32>
    tpu.vector_store %arg3[%c0_84, %c304], %58 {strides = array<i32>} : memref<2x512xf32, #tpu.memory_space<vmem>>, vector<2x16xf32>,
    %c0_85 = arith.constant 0 : index
    %c1_86 = arith.constant 1 : index
    %c4_87 = arith.constant 4 : index
    %c0_88 = arith.constant 0 : index
    %60 = vector.load %arg2[%c0_85, %c1_86, %c4_87, %c0_88] : memref<2x2x16x16xf32, #tpu.memory_space<vmem>>, vector<2x1x1x16xf32>
    %61 = vector.shape_cast %60 : vector<2x1x1x16xf32> to vector<2x16xf32>
    %c0_89 = arith.constant 0 : index
    %c320 = arith.constant 320 : index
    %62 = vector.load %arg3[%c0_89, %c320] : memref<2x512xf32, #tpu.memory_space<vmem>>, vector<2x16xf32>
    tpu.vector_store %arg3[%c0_89, %c320], %61 {strides = array<i32>} : memref<2x512xf32, #tpu.memory_space<vmem>>, vector<2x16xf32>,
    %c0_90 = arith.constant 0 : index
    %c1_91 = arith.constant 1 : index
    %c5_92 = arith.constant 5 : index
    %c0_93 = arith.constant 0 : index
    %63 = vector.load %arg2[%c0_90, %c1_91, %c5_92, %c0_93] : memref<2x2x16x16xf32, #tpu.memory_space<vmem>>, vector<2x1x1x16xf32>
    %64 = vector.shape_cast %63 : vector<2x1x1x16xf32> to vector<2x16xf32>
    %c0_94 = arith.constant 0 : index
    %c336 = arith.constant 336 : index
    %65 = vector.load %arg3[%c0_94, %c336] : memref<2x512xf32, #tpu.memory_space<vmem>>, vector<2x16xf32>
    tpu.vector_store %arg3[%c0_94, %c336], %64 {strides = array<i32>} : memref<2x512xf32, #tpu.memory_space<vmem>>, vector<2x16xf32>,
    %c0_95 = arith.constant 0 : index
    %c1_96 = arith.constant 1 : index
    %c6_97 = arith.constant 6 : index
    %c0_98 = arith.constant 0 : index
    %66 = vector.load %arg2[%c0_95, %c1_96, %c6_97, %c0_98] : memref<2x2x16x16xf32, #tpu.memory_space<vmem>>, vector<2x1x1x16xf32>
    %67 = vector.shape_cast %66 : vector<2x1x1x16xf32> to vector<2x16xf32>
    %c0_99 = arith.constant 0 : index
    %c352 = arith.constant 352 : index
    %68 = vector.load %arg3[%c0_99, %c352] : memref<2x512xf32, #tpu.memory_space<vmem>>, vector<2x16xf32>
    tpu.vector_store %arg3[%c0_99, %c352], %67 {strides = array<i32>} : memref<2x512xf32, #tpu.memory_space<vmem>>, vector<2x16xf32>,
    %c0_100 = arith.constant 0 : index
    %c1_101 = arith.constant 1 : index
    %c7_102 = arith.constant 7 : index
    %c0_103 = arith.constant 0 : index
    %69 = vector.load %arg2[%c0_100, %c1_101, %c7_102, %c0_103] : memref<2x2x16x16xf32, #tpu.memory_space<vmem>>, vector<2x1x1x16xf32>
    %70 = vector.shape_cast %69 : vector<2x1x1x16xf32> to vector<2x16xf32>
    %c0_104 = arith.constant 0 : index
    %c368 = arith.constant 368 : index
    %71 = vector.load %arg3[%c0_104, %c368] : memref<2x512xf32, #tpu.memory_space<vmem>>, vector<2x16xf32>
    tpu.vector_store %arg3[%c0_104, %c368], %70 {strides = array<i32>} : memref<2x512xf32, #tpu.memory_space<vmem>>, vector<2x16xf32>,
    %c0_105 = arith.constant 0 : index
    %c1_106 = arith.constant 1 : index
    %c8_107 = arith.constant 8 : index
    %c0_108 = arith.constant 0 : index
    %72 = vector.load %arg2[%c0_105, %c1_106, %c8_107, %c0_108] : memref<2x2x16x16xf32, #tpu.memory_space<vmem>>, vector<2x1x1x16xf32>
    %73 = vector.shape_cast %72 : vector<2x1x1x16xf32> to vector<2x16xf32>
    %c0_109 = arith.constant 0 : index
    %c384 = arith.constant 384 : index
    %74 = vector.load %arg3[%c0_109, %c384] : memref<2x512xf32, #tpu.memory_space<vmem>>, vector<2x16xf32>
    tpu.vector_store %arg3[%c0_109, %c384], %73 {strides = array<i32>} : memref<2x512xf32, #tpu.memory_space<vmem>>, vector<2x16xf32>,
    %c0_110 = arith.constant 0 : index
    %c1_111 = arith.constant 1 : index
    %c9_112 = arith.constant 9 : index
    %c0_113 = arith.constant 0 : index
    %75 = vector.load %arg2[%c0_110, %c1_111, %c9_112, %c0_113] : memref<2x2x16x16xf32, #tpu.memory_space<vmem>>, vector<2x1x1x16xf32>
    %76 = vector.shape_cast %75 : vector<2x1x1x16xf32> to vector<2x16xf32>
    %c0_114 = arith.constant 0 : index
    %c400 = arith.constant 400 : index
    %77 = vector.load %arg3[%c0_114, %c400] : memref<2x512xf32, #tpu.memory_space<vmem>>, vector<2x16xf32>
    tpu.vector_store %arg3[%c0_114, %c400], %76 {strides = array<i32>} : memref<2x512xf32, #tpu.memory_space<vmem>>, vector<2x16xf32>,
    %c0_115 = arith.constant 0 : index
    %c1_116 = arith.constant 1 : index
    %c10_117 = arith.constant 10 : index
    %c0_118 = arith.constant 0 : index
    %78 = vector.load %arg2[%c0_115, %c1_116, %c10_117, %c0_118] : memref<2x2x16x16xf32, #tpu.memory_space<vmem>>, vector<2x1x1x16xf32>
    %79 = vector.shape_cast %78 : vector<2x1x1x16xf32> to vector<2x16xf32>
    %c0_119 = arith.constant 0 : index
    %c416 = arith.constant 416 : index
    %80 = vector.load %arg3[%c0_119, %c416] : memref<2x512xf32, #tpu.memory_space<vmem>>, vector<2x16xf32>
    tpu.vector_store %arg3[%c0_119, %c416], %79 {strides = array<i32>} : memref<2x512xf32, #tpu.memory_space<vmem>>, vector<2x16xf32>,
    %c0_120 = arith.constant 0 : index
    %c1_121 = arith.constant 1 : index
    %c11_122 = arith.constant 11 : index
    %c0_123 = arith.constant 0 : index
    %81 = vector.load %arg2[%c0_120, %c1_121, %c11_122, %c0_123] : memref<2x2x16x16xf32, #tpu.memory_space<vmem>>, vector<2x1x1x16xf32>
    %82 = vector.shape_cast %81 : vector<2x1x1x16xf32> to vector<2x16xf32>
    %c0_124 = arith.constant 0 : index
    %c432 = arith.constant 432 : index
    %83 = vector.load %arg3[%c0_124, %c432] : memref<2x512xf32, #tpu.memory_space<vmem>>, vector<2x16xf32>
    tpu.vector_store %arg3[%c0_124, %c432], %82 {strides = array<i32>} : memref<2x512xf32, #tpu.memory_space<vmem>>, vector<2x16xf32>,
    %c0_125 = arith.constant 0 : index
    %c1_126 = arith.constant 1 : index
    %c12_127 = arith.constant 12 : index
    %c0_128 = arith.constant 0 : index
    %84 = vector.load %arg2[%c0_125, %c1_126, %c12_127, %c0_128] : memref<2x2x16x16xf32, #tpu.memory_space<vmem>>, vector<2x1x1x16xf32>
    %85 = vector.shape_cast %84 : vector<2x1x1x16xf32> to vector<2x16xf32>
    %c0_129 = arith.constant 0 : index
    %c448 = arith.constant 448 : index
    %86 = vector.load %arg3[%c0_129, %c448] : memref<2x512xf32, #tpu.memory_space<vmem>>, vector<2x16xf32>
    tpu.vector_store %arg3[%c0_129, %c448], %85 {strides = array<i32>} : memref<2x512xf32, #tpu.memory_space<vmem>>, vector<2x16xf32>,
    %c0_130 = arith.constant 0 : index
    %c1_131 = arith.constant 1 : index
    %c13_132 = arith.constant 13 : index
    %c0_133 = arith.constant 0 : index
    %87 = vector.load %arg2[%c0_130, %c1_131, %c13_132, %c0_133] : memref<2x2x16x16xf32, #tpu.memory_space<vmem>>, vector<2x1x1x16xf32>
    %88 = vector.shape_cast %87 : vector<2x1x1x16xf32> to vector<2x16xf32>
    %c0_134 = arith.constant 0 : index
    %c464 = arith.constant 464 : index
    %89 = vector.load %arg3[%c0_134, %c464] : memref<2x512xf32, #tpu.memory_space<vmem>>, vector<2x16xf32>
    tpu.vector_store %arg3[%c0_134, %c464], %88 {strides = array<i32>} : memref<2x512xf32, #tpu.memory_space<vmem>>, vector<2x16xf32>,
    %c0_135 = arith.constant 0 : index
    %c1_136 = arith.constant 1 : index
    %c14_137 = arith.constant 14 : index
    %c0_138 = arith.constant 0 : index
    %90 = vector.load %arg2[%c0_135, %c1_136, %c14_137, %c0_138] : memref<2x2x16x16xf32, #tpu.memory_space<vmem>>, vector<2x1x1x16xf32>
    %91 = vector.shape_cast %90 : vector<2x1x1x16xf32> to vector<2x16xf32>
    %c0_139 = arith.constant 0 : index
    %c480 = arith.constant 480 : index
    %92 = vector.load %arg3[%c0_139, %c480] : memref<2x512xf32, #tpu.memory_space<vmem>>, vector<2x16xf32>
    tpu.vector_store %arg3[%c0_139, %c480], %91 {strides = array<i32>} : memref<2x512xf32, #tpu.memory_space<vmem>>, vector<2x16xf32>,
    %c0_140 = arith.constant 0 : index
    %c1_141 = arith.constant 1 : index
    %c15_142 = arith.constant 15 : index
    %c0_143 = arith.constant 0 : index
    %93 = vector.load %arg2[%c0_140, %c1_141, %c15_142, %c0_143] : memref<2x2x16x16xf32, #tpu.memory_space<vmem>>, vector<2x1x1x16xf32>
    %94 = vector.shape_cast %93 : vector<2x1x1x16xf32> to vector<2x16xf32>
    %c0_144 = arith.constant 0 : index
    %c496 = arith.constant 496 : index
    %95 = vector.load %arg3[%c0_144, %c496] : memref<2x512xf32, #tpu.memory_space<vmem>>, vector<2x16xf32>
    tpu.vector_store %arg3[%c0_144, %c496], %94 {strides = array<i32>} : memref<2x512xf32, #tpu.memory_space<vmem>>, vector<2x16xf32>,
    return
  }
  func.func @transform_0(%arg0: i32, %arg1: i32) -> (i32, i32, i32, i32) {
    %c0_i32 = arith.constant 0 : i32
    %c0_i32_0 = arith.constant 0 : i32
    %c0_i32_1 = arith.constant 0 : i32
    return %arg0, %arg1, %c0_i32, %c0_i32_0 : i32, i32, i32, i32
  }
  func.func @transform_1(%arg0: i32, %arg1: i32) -> (i32, i32) {
    %c0_i32 = arith.constant 0 : i32
    return %arg0, %arg1 : i32, i32
  }
}

</mosaic_0001>

<bundles_post_ra>
// kernel: tpu_custom_call.1
= control target key start
LH: loop header
LB: loop body
LE: loop exit
PB: predicated region body
PF: predicated region fallthrough
CT: control target
= control target key end

     0   :  { %6 = vsyncpa [#allocation3], 0  ;;  %s1437_s0 = inlined_call_operand.hbm [shape: f32[2,4,16,16], index: 0, kind: input, shape index: {}]   ;;  %s1438_s1 = inlined_call_operand.hbm [shape: f32[2,1024], index: 1, kind: output, shape index: {}]  }
   0x1   :  { %8 = vsyncpa [#allocation3 + $0x1], 0 }
   0x2   :  { %9 = vsyncpa [#allocation4], 0 }
   0x3   :  { %11 = vsyncpa [#allocation4 + $0x1], 0  ;;  %s1012_s6 = smov 0   ;;  %s1014_s7 = smov 0  }
   0x4   :  { %s1016_s8 = smov 0   ;;  %s1018_s9 = smov 0  }
   0x5   :  { %s1020_s10 = smov 0   ;;  %s1022_s11 = smov 0  }
   0x6 LB: > { %s775_s12 = sadd.s32 4294967295, %s987_s11   ;;  %s776_s13 = sadd.s32 4294967294, %s987_s11   ;;  %s987_s11 = sphi %s1022_s11, %s17_s11   ;;  %s983_s10 = sphi %s1020_s10, %s1447_s10   ;;  %s979_s9 = sphi %s1018_s9, %s1446_s9   ;;  %s975_s8 = sphi %s1016_s8, %s1445_s8   ;;  %s971_s7 = sphi %s1014_s7, %s1444_s7   ;;  %s967_s6 = sphi %s1012_s6, %s1443_s6  }
   0x7   : > { %s26_s14 = sadd.s32 1, %s983_s10  ;;  %s38_s15 = sadd.s32 1, %s975_s8 }
   0x8   : > { %p27_p0 = scmp.ge.s32.totalorder %s26_s14, 2  ;;  %p45_p1 = scmp.ne.s32.totalorder %s975_s8, %s971_s7 }
   0x9   : > { %p46_p2 = scmp.eq.s32.totalorder %s987_s11, 0  ;;  %p51_p3 = scmp.ne.s32.totalorder %s971_s7, %s967_s6 }
   0xa   : > { %s1449_s14 = smov (%p27_p0, %s26_s14), 0  ;;  %p52_p5 = scmp.eq.s32.totalorder %s775_s12, 0 }
   0xb   : > { %p1053_p4 = por %p46_p2, %p45_p1  ;;  %s34_s17 = ssub.s32 %s983_s10, %s1449_s14 }
   0xc   : > { %p77_p6 = scmp.eq.s32.totalorder %s775_s12, 1  ;;  %p36_p7 = scmp.eq.s32.totalorder %s34_s17, 0 }
   0xd   : > { %p1059_p8 = por %p52_p5, %p51_p3  ;;  %p83_p10 = scmp.eq.s32.totalorder %s776_s13, 1 }
   0xe   : > { %p1063_p9 = por %p77_p6, %p45_p1  ;;  %p778_p12 = scmp.ge.s32.totalorder %s987_s11, 2 }
   0xf   : > { %s1068_s20 = scalar_select %p36_p7, %s975_s8, %s38_s15  }
  0x10   : > { %p1070_p11 = por %p83_p10, %p51_p3  ;;  %99 = sbr.rel (%p778_p12) target bundleno = 35 (0x23), region = 16 }
  0x15   : > { %s103_s22 = sand.u32 1, %s975_s8   ;;  %s826_s23 = sshll.u32 %s983_s10, 5 }
  0x16   : > { %s779_s24 = sshll.u32 %s103_s22, 6  ;;  %s116_s27 = scalar_lea.hbm %s1437_s0, %s826_s23 }
  0x17   : > { %s828_s28 = scalar_select %p1053_p4, [#allocation0], [#allocation8] }
  0x18   : > { %s129_s29 = sshll.u32 %s116_s27, 4  ;;  %s107_s30 = scalar_lea.vmem [#allocation2], %s779_s24  ;;  %s130_s29 = int_to_ptr.hbm [resolvable:$true] %s129_s29 }
  0x19   : > { %s131_s2 = sshll.u32 %s107_s30, 4  ;;  %s121_s3 = sld [smem:[%s828_s28]]   ;;  %s132_s2 = int_to_ptr.vmem [resolvable:$true] %s131_s2 }
  0x1a   : > { %s989_s4 = smov 1024   ;;  %s990_s5 = smov 512  }
  0x1b   : > { %829 = sst [smem:[#allocation7]] (%p1053_p4), %s989_s4  ;;  %s991_s12 = smov 4  }
  0x1c   : > { %830 = sst [smem:[#allocation7 + $0x1]] (%p1053_p4), %s990_s5  ;;  %s992_s13 = smov 128  }
  0x1d   : > { %831 = sst [smem:[#allocation7 + $0x2]] (%p1053_p4), %s991_s12  ;;  %s993_s23 = smov 8  }
  0x1e   : > { %832 = sst [smem:[#allocation7 + $0x3]] (%p1053_p4), %s992_s13  ;;  %s104_s24 = scalar_lea.sflag [#allocation3], %s103_s22 }
  0x1f   : > { %s783_s15 = sshll.u32 %s121_s3, 26  ;;  %833 = sst [smem:[#allocation7 + $0x4]] (%p1053_p4), %s992_s13 }
  0x20   : > { %s784_s17 = sadd.s32 134217728, %s783_s15  ;;  %834 = sst [smem:[#allocation7 + $0x5]] (%p1053_p4), %s993_s23 }
  0x21   : > { %s994_s25 = smov [#allocation6]  }
  0x22   : > { %835 = dma.general (%p1053_p4), %s130_s29, 1024, %s132_s2, %s104_s24, %s994_s25, [#allocation7], %s784_s17, 0  }
  0x23 PF: > { %p785_p13 = scmp.ge.s32.totalorder %s987_s11, 1  ;;  %p152_p0 = scmp.lt.s32.totalorder %s987_s11, 3 }
  0x25   : > { %p153_p1 = pnand %p785_p13, %p152_p0 }
  0x26   : > { %s1101_s26 = sand.u32 (!%p153_p1), 1, %s971_s7  }
  0x27   : > { %156 = sbr.rel (%p153_p1) target bundleno = 243 (0xf3), region = 24  ;;  %s786_s27 = sshll.u32 (!%p153_p1), %s1101_s26, 6 }
  0x28   : > { %s159_s28 = scalar_lea.sflag (!%p153_p1), [#allocation3], %s1101_s26  ;;  %s1105_s30 = scalar_lea.vmem (!%p153_p1), [#allocation2], %s786_s27 }
  0x2c   : > { %958 = dma.done.wait (%p1059_p8), %s159_s28, 1024  }
  0x2d   : > { %960 = vsyncadd (%p1059_p8), %s159_s28, 4294966272  ;;  %vm194_vm0 = vcmask 1041409   ;;  %v205_v0 = vld [vmem:[%s1105_s30 + $0x1] sm:$0x1]  ;;  %vm196_vm1 = vcmask 1043459   ;;  %vm198_vm2 = vcmask 1045509  }
  0x2e   : > { %v206_v1 = vld [vmem:[%s1105_s30 + $0x21] sm:$0x1]  ;;  %v237_v3 = vld [vmem:[%s1105_s30 + $0x3] sm:$0x1]  ;;  %v221_v6 = vld [vmem:[%s1105_s30 + $0x2] sm:$0x1] }
  0x2f   : > { %v211_v2 = vrot.slane %v206_v1, 7  ;;  %v238_v4 = vld [vmem:[%s1105_s30 + $0x23] sm:$0x1]  ;;  %v222_v7 = vld [vmem:[%s1105_s30 + $0x22] sm:$0x1]  ;;  %vm200_vm3 = vcmask 1047559  }
  0x30   : > { %v243_v5 = vrot.slane %v238_v4, 7  ;;  %v227_v9 = vrot.slane %v222_v7, 7  ;;  %v253_v10 = vld [vmem:[%s1105_s30 + $0x4] sm:$0x1]  ;;  %v302_v15 = vld [vmem:[%s1105_s30 + $0x27] sm:$0x1] }
  0x31   : > { %v212_v8 = vsel %vm194_vm0, %v211_v2, %v205_v0  ;;  %v254_v11 = vld [vmem:[%s1105_s30 + $0x24] sm:$0x1]  ;;  %v331_v19 = vld [vmem:[%s1105_s30 + $0x29] sm:$0x1]  ;;  %s995_s16 = smov 16   ;;  %v307_v26 = vrot.slane %v302_v15, 7 }
  0x32   : > { %v213_v12 = vsel %vm196_vm1, %v211_v2, %v212_v8  ;;  %v244_v13 = vsel %vm194_vm0, %v243_v5, %v237_v3  ;;  %v259_v14 = vrot.slane %v254_v11, 7  ;;  %v228_v18 = vsel %vm194_vm0, %v227_v9, %v221_v6  ;;  %v270_v27 = vld [vmem:[%s1105_s30 + $0x25] sm:$0x1]  ;;  %s996_s18 = smov 48   ;;  %v301_v28 = vld [vmem:[%s1105_s30 + $0x7] sm:$0x1] }
  0x33   : > { %v214_v16 = vsel %vm198_vm2, %v211_v2, %v213_v12  ;;  %v245_v17 = vsel %vm196_vm1, %v243_v5, %v244_v13  ;;  %v229_v22 = vsel %vm196_vm1, %v227_v9, %v228_v18  ;;  %v336_v29 = vrot.slane %v331_v19, 7  ;;  %v330_v31 = vld [vmem:[%s1105_s30 + $0x9] sm:$0x1]  ;;  %v269_v32 = vld [vmem:[%s1105_s30 + $0x5] sm:$0x1]  ;;  %s997_s22 = smov 32  }
  0x34   : > { %v215_v20 = vsel %vm200_vm3, %v211_v2, %v214_v16  ;;  %v246_v21 = vsel %vm198_vm2, %v243_v5, %v245_v17  ;;  %v260_v23 = vsel %vm194_vm0, %v259_v14, %v253_v10  ;;  %v230_v30 = vsel %vm198_vm2, %v227_v9, %v229_v22  ;;  %v286_v33 = vld [vmem:[%s1105_s30 + $0x26] sm:$0x1]  ;;  %v361_v40 = vld [vmem:[%s1105_s30 + $0x2b] sm:$0x1]  ;;  %v376_v44 = vld [vmem:[%s1105_s30 + $0x2c] sm:$0x1] }
  0x35   : > { %216 = vrot.lane.b32.xlu0 %v215_v20, %s995_s16  ;;  %v247_v24 = vsel %vm200_vm3, %v243_v5, %v246_v21  ;;  %v261_v25 = vsel %vm196_vm1, %v259_v14, %v260_v23  ;;  %v275_v35 = vrot.slane %v270_v27, 7  ;;  %v308_v36 = vsel %vm194_vm0, %v307_v26, %v301_v28  ;;  %v285_v42 = vld [vmem:[%s1105_s30 + $0x6] sm:$0x1]  ;;  %v346_v52 = vld [vmem:[%s1105_s30 + $0x2a] sm:$0x1]  ;;  %s998_s29 = smov 64  }
  0x36   : > { %248 = vrot.lane.b32.xlu1 %v247_v24, %s996_s18  ;;  %v262_v34 = vsel %vm198_vm2, %v259_v14, %v261_v25  ;;  %v291_v37 = vrot.slane %v286_v33, 7  ;;  %v231_v38 = vsel %vm200_vm3, %v227_v9, %v230_v30  ;;  %v337_v39 = vsel %vm194_vm0, %v336_v29, %v330_v31  ;;  %v360_v53 = vld [vmem:[%s1105_s30 + $0xb] sm:$0x1]  ;;  %s999_s2 = smov 80   ;;  %v375_v58 = vld [vmem:[%s1105_s30 + $0xc] sm:$0x1] }
  0x37   : > { %v276_v41 = vsel %vm194_vm0, %v275_v35, %v269_v32  ;;  %v263_v43 = vsel %vm200_vm3, %v259_v14, %v262_v34  ;;  %v309_v46 = vsel %vm196_vm1, %v307_v26, %v308_v36  ;;  %v338_v48 = vsel %vm196_vm1, %v336_v29, %v337_v39  ;;  %v345_v59 = vld [vmem:[%s1105_s30 + $0xa] sm:$0x1]  ;;  %v406_v1 = vld [vmem:[%s1105_s30 + $0x2e] sm:$0x1]  ;;  %v791_v5 = vld [vmem:[%s1105_s30 + $0x31] sm:$0x1] }
  0x38   : > { %v277_v45 = vsel %vm196_vm1, %v275_v35, %v276_v41  ;;  %v366_v49 = vrot.slane %v361_v40, 7  ;;  %v292_v51 = vsel %vm194_vm0, %v291_v37, %v285_v42  ;;  %v381_v54 = vrot.slane %v376_v44, 7  ;;  %s1000_s3 = smov 112   ;;  %v391_v10 = vld [vmem:[%s1105_s30 + $0x2d] sm:$0x1]  ;;  %s1001_s4 = smov 96  }
  0x39   : > { %v278_v47 = vsel %vm198_vm2, %v275_v35, %v277_v45  ;;  %v293_v55 = vsel %vm196_vm1, %v291_v37, %v292_v51  ;;  %v351_v56 = vrot.slane %v346_v52, 7  ;;  %v310_v57 = vsel %vm198_vm2, %v307_v26, %v309_v46  ;;  %v405_v11 = vld [vmem:[%s1105_s30 + $0xe] sm:$0x1]  ;;  %v790_v15 = vld [vmem:[%s1105_s30 + $0x11] sm:$0x1]  ;;  %s787_s5 = sshll.u32 %s1101_s26, 3 }
  0x3a   : > { %v279_v50 = vsel %vm200_vm3, %v275_v35, %v278_v47  ;;  %v339_v60 = vsel %vm198_vm2, %v336_v29, %v338_v48  ;;  %v294_v61 = vsel %vm198_vm2, %v291_v37, %v293_v55  ;;  %v367_v62 = vsel %vm194_vm0, %v366_v49, %v360_v53  ;;  %v390_v16 = vld [vmem:[%s1105_s30 + $0xd] sm:$0x1]  ;;  %v793_v22 = vld [vmem:[%s1105_s30 + $0x32] sm:$0x1]  ;;  %v807_v33 = vld [vmem:[%s1105_s30 + $0x39] sm:$0x1] }
  0x3b   : > { %280 = vrot.lane.b32.xlu2 %v279_v50, %s999_s2  ;;  %v311_v63 = vsel %vm200_vm3, %v307_v26, %v310_v57  ;;  %v382_v0 = vsel %vm194_vm0, %v381_v54, %v375_v58  ;;  %v352_v2 = vsel %vm194_vm0, %v351_v56, %v345_v59  ;;  %v340_v3 = vsel %vm200_vm3, %v336_v29, %v339_v60  ;;  %v809_v26 = vld [vmem:[%s1105_s30 + $0x3a] sm:$0x1]  ;;  %v792_v31 = vld [vmem:[%s1105_s30 + $0x12] sm:$0x1]  ;;  %v806_v36 = vld [vmem:[%s1105_s30 + $0x19] sm:$0x1] }
  0x3c   : > { %v295_v4 = vsel %vm200_vm3, %v291_v37, %v294_v61  ;;  %v368_v6 = vsel %vm196_vm1, %v366_v49, %v367_v62  ;;  %v383_v7 = vsel %vm196_vm1, %v381_v54, %v382_v0  ;;  %v411_v8 = vrot.slane %v406_v1, 7  ;;  %v808_v35 = vld [vmem:[%s1105_s30 + $0x1a] sm:$0x1]  ;;  %v797_v47 = vld [vmem:[%s1105_s30 + $0x34] sm:$0x1]  ;;  %s1314_s12 = scalar_lea.vmem [#allocation5], %s787_s5 }
  0x3d   : > { %232 = vrot.lane.b32.xlu0 %v231_v38, %s997_s22  ;;  %v353_v9 = vsel %vm196_vm1, %v351_v56, %v352_v2  ;;  %v455_v12 = vrot.slane %v791_v5, 7  ;;  %v396_v13 = vrot.slane %v391_v10, 7  ;;  %v369_v14 = vsel %vm198_vm2, %v366_v49, %v368_v6  ;;  %v795_v52 = vld [vmem:[%s1105_s30 + $0x33] sm:$0x1]  ;;  %v810_v53 = vld [vmem:[%s1105_s30 + $0x1b] sm:$0x1] }
  0x3e   : > { %264 = vrot.lane.b32.xlu1 %v263_v43, %s998_s29  ;;  %v384_v17 = vsel %vm198_vm2, %v381_v54, %v383_v7  ;;  %v354_v18 = vsel %vm198_vm2, %v351_v56, %v353_v9  ;;  %v412_v19 = vsel %vm194_vm0, %v411_v8, %v405_v11  ;;  %v370_v20 = vsel %vm200_vm3, %v366_v49, %v369_v14  ;;  %v811_v43 = vld [vmem:[%s1105_s30 + $0x3b] sm:$0x1]  ;;  %v796_v57 = vld [vmem:[%s1105_s30 + $0x14] sm:$0x1]  ;;  %v794_v58 = vld [vmem:[%s1105_s30 + $0x13] sm:$0x1] }
  0x3f   : > { %v456_v21 = vsel %vm194_vm0, %v455_v12, %v790_v15  ;;  %v397_v23 = vsel %vm194_vm0, %v396_v13, %v390_v16  ;;  %v385_v24 = vsel %vm200_vm3, %v381_v54, %v384_v17  ;;  %v355_v25 = vsel %vm200_vm3, %v351_v56, %v354_v18  ;;  %v799_v0 = vld [vmem:[%s1105_s30 + $0x35] sm:$0x1]  ;;  %v813_v9 = vld [vmem:[%s1105_s30 + $0x3c] sm:$0x1]  ;;  %v814_v14 = vld [vmem:[%s1105_s30 + $0x1d] sm:$0x1] }
  0x40   : > { %v413_v27 = vsel %vm196_vm1, %v411_v8, %v412_v19  ;;  %v457_v28 = vsel %vm196_vm1, %v455_v12, %v456_v21  ;;  %v470_v29 = vrot.slane %v793_v22, 7  ;;  %v398_v30 = vsel %vm196_vm1, %v396_v13, %v397_v23  ;;  %v798_v10 = vld [vmem:[%s1105_s30 + $0x15] sm:$0x1]  ;;  %v812_v15 = vld [vmem:[%s1105_s30 + $0x1c] sm:$0x1]  ;;  %s827_s13 = sshll.u32 %s979_s9, 3 }
  0x41   : > { %v588_v32 = vrot.slane %v809_v26, 7  ;;  %v414_v34 = vsel %vm198_vm2, %v411_v8, %v413_v27  ;;  %v573_v37 = vrot.slane %v807_v33, 7  ;;  %v458_v38 = vsel %vm198_vm2, %v455_v12, %v457_v28  ;;  %v817_v21 = vld [vmem:[%s1105_s30 + $0x3e] sm:$0x1]  ;;  %v801_v26 = vld [vmem:[%s1105_s30 + $0x36] sm:$0x1]  ;;  %s686_s23 = scalar_lea.hbm %s1438_s1, %s827_s13 }
  0x42   : > { %v399_v39 = vsel %vm198_vm2, %v396_v13, %v398_v30  ;;  %v471_v40 = vsel %vm194_vm0, %v470_v29, %v792_v31  ;;  %v415_v41 = vsel %vm200_vm3, %v411_v8, %v414_v34  ;;  %v459_v45 = vsel %vm200_vm3, %v455_v12, %v458_v38  ;;  %v816_v31 = vld [vmem:[%s1105_s30 + $0x1e] sm:$0x1]  ;;  %s688_s24 = sshll.u32 %s1314_s12, 4  ;;  %s690_s25 = sshll.u32 %s686_s23, 4  ;;  %s689_s24 = int_to_ptr.vmem [resolvable:$true] %s688_s24  ;;  %s691_s25 = int_to_ptr.hbm [resolvable:$true] %s690_s25 }
  0x43   : > { %296 = vrot.lane.b32.xlu2 %v295_v4, %s1001_s4  ;;  %v589_v42 = vsel %vm194_vm0, %v588_v32, %v808_v35  ;;  %v574_v44 = vsel %vm194_vm0, %v573_v37, %v806_v36  ;;  %v400_v46 = vsel %vm200_vm3, %v396_v13, %v399_v39  ;;  %v472_v48 = vsel %vm196_vm1, %v470_v29, %v471_v40  ;;  %v420_v35 = vld [vmem:[%s1105_s30 + $0xf] sm:$0x1]  ;;  %v800_v36 = vld [vmem:[%s1105_s30 + $0x16] sm:$0x1]  ;;  %s673_s27 = scalar_lea.sflag [#allocation4], %s1101_s26  ;;  %s919_s9 = sshra.s32 %s691_s25, 4  ;;  %s920_s9 = int_to_ptr.hbm [resolvable:$true] %s919_s9 }
  0x44   : > { %v590_v49 = vsel %vm196_vm1, %v588_v32, %v589_v42  ;;  %v603_v50 = vrot.slane %v811_v43, 7  ;;  %v575_v51 = vsel %vm196_vm1, %v573_v37, %v574_v44  ;;  %v500_v54 = vrot.slane %v797_v47, 7  ;;  %v819_v42 = vld [vmem:[%s1105_s30 + $0x3f] sm:$0x1]  ;;  %s921_s28 = scalar_lea.hbm %s920_s9, 8  ;;  %p926_p5 = scmp.lt.s32.totalorder %s920_s9, %s1438_s1 }
  0x45   : > { %312 = vrot.lane.b32.xlu0 %v311_v63, %s1000_s3  ;;  %v485_v55 = vrot.slane %v795_v52, 7  ;;  %v473_v56 = vsel %vm198_vm2, %v470_v29, %v472_v48  ;;  %v591_v59 = vsel %vm198_vm2, %v588_v32, %v590_v49  ;;  %v576_v60 = vsel %vm198_vm2, %v573_v37, %v575_v51  ;;  %v818_v51 = vld [vmem:[%s1105_s30 + $0x1f] sm:$0x1]  ;;  %p922_p2 = scmp.ne.s32.totalorder %s920_s9, %s921_s28 }
  0x46   : > { %341 = vrot.lane.b32.xlu1 %v340_v3, %s995_s16  ;;  %v604_v61 = vsel %vm194_vm0, %v603_v50, %v810_v53  ;;  %v474_v62 = vsel %vm200_vm3, %v470_v29, %v473_v56  ;;  %v501_v63 = vsel %vm194_vm0, %v500_v54, %v796_v57  ;;  %v592_v2 = vsel %vm200_vm3, %v588_v32, %v591_v59  ;;  %v815_v3 = vld [vmem:[%s1105_s30 + $0x3d] sm:$0x1] }
  0x47   : > { %v486_v1 = vsel %vm194_vm0, %v485_v55, %v794_v58  ;;  %v577_v4 = vsel %vm200_vm3, %v573_v37, %v576_v60  ;;  %v605_v5 = vsel %vm196_vm1, %v603_v50, %v604_v61  ;;  %v502_v6 = vsel %vm196_vm1, %v500_v54, %v501_v63  ;;  %p923_p3 = pnand %p922_p2, %p1063_p9 }
  0x48   : > { %v515_v7 = vrot.slane %v799_v0, 7  ;;  %v487_v8 = vsel %vm196_vm1, %v485_v55, %v486_v1  ;;  %v633_v11 = vrot.slane %v815_v3, 7  ;;  %v618_v12 = vrot.slane %v813_v9, 7 }
  0x49   : > { %v606_v13 = vsel %vm198_vm2, %v603_v50, %v605_v5  ;;  %v503_v16 = vsel %vm198_vm2, %v500_v54, %v502_v6  ;;  %v488_v17 = vsel %vm198_vm2, %v485_v55, %v487_v8  ;;  %v648_v29 = vrot.slane %v817_v21, 7  ;;  %v185_v6 = vld [vmem:[%s1105_s30] sm:$0x1]  ;;  %v789_v21 = vld [vmem:[%s1105_s30 + $0x30] sm:$0x1]  ;;  %p924_p4 = pneg %p923_p3 }
  0x4a   : > { %v516_v18 = vsel %vm194_vm0, %v515_v7, %v798_v10  ;;  %v607_v19 = vsel %vm200_vm3, %v603_v50, %v606_v13  ;;  %v619_v22 = vsel %vm194_vm0, %v618_v12, %v812_v15  ;;  %v504_v23 = vsel %vm200_vm3, %v500_v54, %v503_v16  ;;  %v802_v54 = vld [vmem:[%s1105_s30 + $0x17] sm:$0x1] }
  0x4b   : > { %356 = vrot.lane.b32.xlu2 %v355_v25, %s997_s22  ;;  %v421_v25 = vld [vmem:[%s1105_s30 + $0x2f] sm:$0x1]  ;;  %v517_v27 = vsel %vm196_vm1, %v515_v7, %v516_v18  ;;  %v620_v30 = vsel %vm196_vm1, %v618_v12, %v619_v22  ;;  %v530_v33 = vrot.slane %v801_v26, 7  ;;  %v649_v39 = vsel %vm194_vm0, %v648_v29, %v816_v31  ;;  %v804_v26 = vld [vmem:[%s1105_s30 + $0x18] sm:$0x1] }
  0x4c   : > { %v426_v32 = vrot.slane %v421_v25, 7  ;;  %v518_v34 = vsel %vm198_vm2, %v515_v7, %v517_v27  ;;  %v621_v38 = vsel %vm198_vm2, %v618_v12, %v620_v30  ;;  %v650_v47 = vsel %vm196_vm1, %v648_v29, %v649_v39  ;;  %v805_v27 = vld [vmem:[%s1105_s30 + $0x38] sm:$0x1] }
  0x4d   : > { %371 = vrot.lane.b32.xlu0 %v370_v20, %s996_s18  ;;  %v634_v20 = vsel %vm194_vm0, %v633_v11, %v814_v14  ;;  %v519_v40 = vsel %vm200_vm3, %v515_v7, %v518_v34  ;;  %v531_v43 = vsel %vm194_vm0, %v530_v33, %v800_v36  ;;  %v663_v49 = vrot.slane %v819_v42, 7  ;;  %v317_v14 = vld [vmem:[%s1105_s30 + $0x8] sm:$0x1] }
  0x4e   : > { %386 = vrot.lane.b32.xlu1 %v385_v24, %s998_s29  ;;  %v489_v24 = vsel %vm200_vm3, %v485_v55, %v488_v17  ;;  %v635_v28 = vsel %vm196_vm1, %v633_v11, %v634_v20  ;;  %v532_v50 = vsel %vm196_vm1, %v530_v33, %v531_v43  ;;  %v651_v53 = vsel %vm198_vm2, %v648_v29, %v650_v47 }
  0x4f   : > { %v636_v37 = vsel %vm198_vm2, %v633_v11, %v635_v28  ;;  %v533_v56 = vsel %vm198_vm2, %v530_v33, %v532_v50  ;;  %v664_v57 = vsel %vm194_vm0, %v663_v49, %v818_v51  ;;  %v652_v58 = vsel %vm200_vm3, %v648_v29, %v651_v53 }
  0x50   : > { %v637_v44 = vsel %vm200_vm3, %v633_v11, %v636_v37  ;;  %v534_v61 = vsel %vm200_vm3, %v530_v33, %v533_v56  ;;  %vm203_vm4 = vcmask 123904   ;;  %v318_v11 = vld [vmem:[%s1105_s30 + $0x28] sm:$0x1]  ;;  %vm219_vm5 = vcmask 255104  }
  0x51   : > { %v442_v25 = vrot.slane %v789_v21, 7  ;;  %v560_v29 = vrot.slane %v805_v27, 7  ;;  %vm235_vm6 = vcmask 386304   ;;  %vm251_vm7 = vcmask 517504  }
  0x52   : > { %vm267_vm8 = vcmask 648704   ;;  %vm283_vm9 = vcmask 779904   ;;  %vm299_vm10 = vcmask 911104   ;;  %vm315_vm11 = vcmask 1042304  }
  0x53   : > { %401 = vrot.lane.b32.xlu2 %v400_v46, %s999_s2  ;;  %v803_v46 = vld [vmem:[%s1105_s30 + $0x37] sm:$0x1] }
  0x54   : > { %v545_v52 = vrot.slane %v803_v46, 7 }
  0x55   : > { %416 = vrot.lane.b32.xlu0 %v415_v41, %s1001_s4  ;;  %v427_v41 = vsel %vm194_vm0, %v426_v32, %v420_v35 }
  0x56   : > { %460 = vrot.lane.b32.xlu1 %v459_v45, %s995_s16  ;;  %v622_v45 = vsel %vm200_vm3, %v618_v12, %v621_v38  ;;  %v428_v48 = vsel %vm196_vm1, %v426_v32, %v427_v41  ;;  %v546_v59 = vsel %vm194_vm0, %v545_v52, %v802_v54  ;;  %v323_v12 = vrot.slane %v318_v11, 7 }
  0x57   : > { %v429_v55 = vsel %vm198_vm2, %v426_v32, %v428_v48  ;;  %v547_v63 = vsel %vm196_vm1, %v545_v52, %v546_v59 }
  0x58   : > { %v430_v60 = vsel %vm200_vm3, %v426_v32, %v429_v55  ;;  %v548_v1 = vsel %vm198_vm2, %v545_v52, %v547_v63  ;;  %v324_v15 = vsel %vm194_vm0, %v323_v12, %v317_v14  ;;  %v561_v32 = vsel %vm194_vm0, %v560_v29, %v804_v26 }
  0x59   : > { %v549_v3 = vsel %vm200_vm3, %v545_v52, %v548_v1  ;;  %v325_v16 = vsel %vm196_vm1, %v323_v12, %v324_v15  ;;  %v562_v34 = vsel %vm196_vm1, %v560_v29, %v561_v32 }
  0x5a   : > { %v326_v17 = vsel %vm198_vm2, %v323_v12, %v325_v16  ;;  %v563_v36 = vsel %vm198_vm2, %v560_v29, %v562_v34 }
  0x5b   : > { %578 = vrot.lane.b32.xlu2 %v577_v4, %s995_s16  ;;  %v186_v4 = vld [vmem:[%s1105_s30 + $0x20] sm:$0x1]  ;;  %v327_v18 = vsel %vm200_vm3, %v323_v12, %v326_v17  ;;  %v564_v39 = vsel %vm200_vm3, %v560_v29, %v563_v36 }
  0x5c   : > { %v193_v5 = vrot.slane %v186_v4, 7  ;;  %329 = vst.msk [vmem:[%s1314_s12 + $0x2] sm:$0x3] %vm203_vm4, %v327_v18 }
  0x5d   : > { %475 = vrot.lane.b32.xlu0 %v474_v62, %s997_s22  ;;  %v665_v62 = vsel %vm196_vm1, %v663_v49, %v664_v57  ;;  %566 = vst.msk [vmem:[%s1314_s12 + $0x6] sm:$0x3] %vm203_vm4, %v564_v39 }
  0x5e   : > { %593 = vrot.lane.b32.xlu1 %v592_v2, %s997_s22  ;;  %v666_v0 = vsel %vm198_vm2, %v663_v49, %v665_v62  ;;  %v195_v7 = vsel %vm194_vm0, %v193_v5, %v185_v6 }
  0x5f   : > { %v667_v2 = vsel %vm200_vm3, %v663_v49, %v666_v0  ;;  %v197_v8 = vsel %vm196_vm1, %v193_v5, %v195_v7 }
  0x60   : > { %v199_v9 = vsel %vm198_vm2, %v193_v5, %v197_v8 }
  0x61   : > { %v201_v10 = vsel %vm200_vm3, %v193_v5, %v199_v9 }
  0x62   : > { %204 = vst.msk [vmem:[%s1314_s12] sm:$0x3] %vm203_vm4, %v201_v10 }
  0x63   : > { %490 = vrot.lane.b32.xlu2 %v489_v24, %s996_s18  ;;  %v788_v24 = vld [vmem:[%s1105_s30 + $0x10] sm:$0x1] }
  0x64   : > { %v443_v28 = vsel %vm194_vm0, %v442_v25, %v788_v24 }
  0x65   : > { %608 = vrot.lane.b32.xlu0 %v607_v19, %s996_s18  ;;  %v444_v30 = vsel %vm196_vm1, %v442_v25, %v443_v28  ;;  %s925_s18 = scalar_lea.hbm %s1438_s1, 16 }
  0x66   : > { %505 = vrot.lane.b32.xlu1 %v504_v23, %s998_s29  ;;  %v445_v31 = vsel %vm198_vm2, %v442_v25, %v444_v30  ;;  %p927_p6 = scmp.lt.s32.totalorder %s925_s18, %s921_s28 }
  0x67   : > { %v446_v33 = vsel %vm200_vm3, %v442_v25, %v445_v31 }
  0x68   : > { %448 = vst.msk [vmem:[%s1314_s12 + $0x4] sm:$0x3] %vm203_vm4, %v446_v33  ;;  %p928_p7 = por %p927_p6, %p926_p5 }
  0x6a   : > { %p929_p8 = pnand %p928_p7, %p924_p4 }
  0x6b   : > { %623 = vrot.lane.b32.xlu2 %v622_v45, %s998_s29 }
  0x6d   : > { %520 = vrot.lane.b32.xlu0 %v519_v40, %s999_s2 }
  0x6e   : > { %638 = vrot.lane.b32.xlu1 %v637_v44, %s999_s2 }
  0x73   : > { %535 = vrot.lane.b32.xlu2 %v534_v61, %s1001_s4 }
  0x75   : > { %653 = vrot.lane.b32.xlu0 %v652_v58, %s1001_s4 }
  0x76   : > { %431 = vrot.lane.b32.xlu1 %v430_v60, %s1000_s3 }
  0x7b   : > { %550 = vrot.lane.b32.xlu2 %v549_v3, %s1000_s3 }
  0x7d   : > { %668 = vrot.lane.b32.xlu0 %v667_v2, %s1000_s3 }
  0x95   : > { %v281_v13 = vpop.permute.xlu2 %280 }
  0x9d   : > { %v297_v19 = vpop.permute.xlu2 %296 }
  0xa5   : > { %v357_v23 = vpop.permute.xlu2 %356 }
  0xa7   : > { %v217_v20 = vpop.permute.xlu0 %216 }
  0xa8   : > { %220 = vst.msk [vmem:[%s1314_s12] sm:$0x3] %vm219_vm5, %v217_v20  ;;  %v249_v22 = vpop.permute.xlu1 %248 }
  0xad   : > { %v402_v38 = vpop.permute.xlu2 %401 }
  0xaf   : > { %v233_v35 = vpop.permute.xlu0 %232 }
  0xb0   : > { %236 = vst.msk [vmem:[%s1314_s12] sm:$0x3] %vm235_vm6, %v233_v35  ;;  %v265_v37 = vpop.permute.xlu1 %264 }
  0xb1   : > { %252 = vst.msk [vmem:[%s1314_s12] sm:$0x3] %vm251_vm7, %v249_v22 }
  0xb2   : > { %268 = vst.msk [vmem:[%s1314_s12] sm:$0x3] %vm267_vm8, %v265_v37 }
  0xb3   : > { %284 = vst.msk [vmem:[%s1314_s12] sm:$0x3] %vm283_vm9, %v281_v13 }
  0xb4   : > { %300 = vst.msk [vmem:[%s1314_s12] sm:$0x3] %vm299_vm10, %v297_v19 }
  0xb5   : > { %v579_v42 = vpop.permute.xlu2 %578 }
  0xb6   : > { %581 = vst.msk [vmem:[%s1314_s12 + $0x6] sm:$0x3] %vm219_vm5, %v579_v42 }
  0xb7   : > { %v313_v40 = vpop.permute.xlu0 %312 }
  0xb8   : > { %316 = vst.msk [vmem:[%s1314_s12] sm:$0x3] %vm315_vm11, %v313_v40  ;;  %v342_v41 = vpop.permute.xlu1 %341 }
  0xb9   : > { %344 = vst.msk [vmem:[%s1314_s12 + $0x2] sm:$0x3] %vm219_vm5, %v342_v41 }
  0xba   : > { %359 = vst.msk [vmem:[%s1314_s12 + $0x2] sm:$0x3] %vm235_vm6, %v357_v23 }
  0xbd   : > { %v491_v45 = vpop.permute.xlu2 %490 }
  0xbf   : > { %v372_v43 = vpop.permute.xlu0 %371 }
  0xc0   : > { %374 = vst.msk [vmem:[%s1314_s12 + $0x2] sm:$0x3] %vm251_vm7, %v372_v43  ;;  %v387_v44 = vpop.permute.xlu1 %386 }
  0xc1   : > { %389 = vst.msk [vmem:[%s1314_s12 + $0x2] sm:$0x3] %vm267_vm8, %v387_v44 }
  0xc2   : > { %404 = vst.msk [vmem:[%s1314_s12 + $0x2] sm:$0x3] %vm283_vm9, %v402_v38 }
  0xc5   : > { %v624_v48 = vpop.permute.xlu2 %623 }
  0xc7   : > { %v417_v46 = vpop.permute.xlu0 %416 }
  0xc8   : > { %419 = vst.msk [vmem:[%s1314_s12 + $0x2] sm:$0x3] %vm299_vm10, %v417_v46  ;;  %v461_v47 = vpop.permute.xlu1 %460 }
  0xc9   : > { %463 = vst.msk [vmem:[%s1314_s12 + $0x4] sm:$0x3] %vm219_vm5, %v461_v47 }
  0xcd   : > { %v536_v51 = vpop.permute.xlu2 %535 }
  0xcf   : > { %v476_v49 = vpop.permute.xlu0 %475 }
  0xd0   : > { %478 = vst.msk [vmem:[%s1314_s12 + $0x4] sm:$0x3] %vm235_vm6, %v476_v49  ;;  %v594_v50 = vpop.permute.xlu1 %593 }
  0xd1   : > { %596 = vst.msk [vmem:[%s1314_s12 + $0x6] sm:$0x3] %vm235_vm6, %v594_v50 }
  0xd2   : > { %493 = vst.msk [vmem:[%s1314_s12 + $0x4] sm:$0x3] %vm251_vm7, %v491_v45 }
  0xd5   : > { %v551_v56 = vpop.permute.xlu2 %550 }
  0xd7   : > { %v609_v52 = vpop.permute.xlu0 %608 }
  0xd8   : > { %611 = vst.msk [vmem:[%s1314_s12 + $0x6] sm:$0x3] %vm251_vm7, %v609_v52  ;;  %v506_v53 = vpop.permute.xlu1 %505 }
  0xd9   : > { %508 = vst.msk [vmem:[%s1314_s12 + $0x4] sm:$0x3] %vm267_vm8, %v506_v53 }
  0xda   : > { %626 = vst.msk [vmem:[%s1314_s12 + $0x6] sm:$0x3] %vm267_vm8, %v624_v48 }
  0xdf   : > { %v521_v54 = vpop.permute.xlu0 %520 }
  0xe0   : > { %523 = vst.msk [vmem:[%s1314_s12 + $0x4] sm:$0x3] %vm283_vm9, %v521_v54  ;;  %v639_v55 = vpop.permute.xlu1 %638 }
  0xe1   : > { %641 = vst.msk [vmem:[%s1314_s12 + $0x6] sm:$0x3] %vm283_vm9, %v639_v55 }
  0xe2   : > { %538 = vst.msk [vmem:[%s1314_s12 + $0x4] sm:$0x3] %vm299_vm10, %v536_v51 }
  0xe3   : > { %553 = vst.msk [vmem:[%s1314_s12 + $0x4] sm:$0x3] %vm315_vm11, %v551_v56 }
  0xe7   : > { %v654_v57 = vpop.permute.xlu0 %653 }
  0xe8   : > { %656 = vst.msk [vmem:[%s1314_s12 + $0x6] sm:$0x3] %vm299_vm10, %v654_v57  ;;  %v432_v58 = vpop.permute.xlu1 %431 }
  0xe9   : > { %434 = vst.msk [vmem:[%s1314_s12 + $0x2] sm:$0x3] %vm315_vm11, %v432_v58 }
  0xef   : > { %v669_v59 = vpop.permute.xlu0 %668 }
  0xf0   : > { %671 = vst.msk [vmem:[%s1314_s12 + $0x6] sm:$0x3] %vm315_vm11, %v669_v59 }
  0xf1   : > { %932 = shalt.err (!%p929_p8)
}
  0xf2   : > { %837 = dma.vmem_to_hbm [thread:$0]  (%p1063_p9), %s689_s24, 128, %s691_s25, %s673_s27  }
  0xf3 PF: > { %s702_s26 = sand.u32 1, %s967_s6   ;;  %p840_p10 = pnand %p778_p12, %p1070_p11 }
  0xf4   : > { %s703_s2 = scalar_lea.sflag [#allocation4], %s702_s26 }
  0xf5   : > { %p841_p13 = pneg %p840_p10 }
  0xf7   : > { %962 = dma.done.wait (%p841_p13), %s703_s2, 128  }
  0xf8   : > { %964 = vsyncadd (%p841_p13), %s703_s2, 4294967168  ;;  %s17_s11 = sadd.s32 1, %s987_s11   ;;  %s1443_s6 = smov %s971_s7 }
  0xf9   : > { %p14_p0 = scmp.ge.s32.totalorder %s17_s11, 4   ;;  %s1444_s7 = smov %s975_s8 }
  0xfa   : > { %s1445_s8 = smov %s1068_s20  ;;  %s1446_s9 = smov %s983_s10 }
  0xfb   : > { %s1447_s10 = smov %s1449_s14  ;;  %16 = sbr.rel (!%p14_p0) target bundleno = 6 (0x6), region = 75 }
 0x100   :  { %709 = vsyncpa [#allocation3], 1 }
 0x101   :  { %711 = vsyncpa [#allocation3 + $0x1], 1 }
 0x102   :  { %712 = vsyncpa [#allocation4], 1 }
 0x103   :  { %714 = vsyncpa [#allocation4 + $0x1], 1 }

</bundles_post_ra>
